<compile_context>
chip_gen: v5e
topology: v5e:2x2
jax: 0.10.0
libtpu: 0.0.40
codegen_flags: <defaults>
</compile_context>

<pallas_src>
import jax
import jax.numpy as jnp
from jax.experimental import pallas as pl
from jax.experimental.pallas import tpu as pltpu


_LANES = 128          # vreg lane width
_ACC_ROWS_MAX = 512   # fixed-size partial-sum accumulator rows


def _make_kernel(M, tile_rows, acc_rows, lanes):
    """Kernel closed over static sizes.

    Grid = (num_cores, steps_per_core):
      axis 0 ("parallel")  -> TensorCore split on multi-TC chips (v7x)
      axis 1 ("arbitrary") -> sequential reduction over row tiles
    The two outputs are per-core (1, acc_rows, lanes) partial sums that stay
    resident in VMEM across the reduction axis (accumulator pattern).
    """
    chunks = [(off, min(acc_rows, tile_rows - off))
              for off in range(0, tile_rows, acc_rows)]

    def kernel(x_ref, t_ref, r_ref, num_ref, den_ref):
        p = pl.program_id(0)
        i = pl.program_id(1)
        steps = pl.num_programs(1)
        gb = p * steps + i                    # logical global row-block index

        @pl.when(i == 0)
        def _():
            num_ref[...] = jnp.zeros_like(num_ref)
            den_ref[...] = jnp.zeros_like(den_ref)

        def accumulate(masked):
            # Static (unrolled) chunk loop: VPU-only accumulation into the
            # fixed-size per-core partial sums; no per-step XLU reduce.
            for off, cs in chunks:
                x = x_ref[off:off + cs, :].astype(jnp.float32)
                t = t_ref[off:off + cs, :].astype(jnp.float32)
                r = r_ref[off:off + cs, :].astype(jnp.float32)
                # sigmoid(x) = 0.5 * tanh(0.5*x) + 0.5 : 1 EUP op + 2 VPU ops
                s = 0.5 * jnp.tanh(0.5 * x) + 0.5
                d = s - t
                num = d * d * r
                den = r
                if masked:
                    # Row-level validity mask; only partial / overhanging edge
                    # blocks take this path.  Mask the full products: rows past
                    # the array end may hold NaN/Inf garbage.
                    row = jax.lax.broadcasted_iota(jnp.int32, (cs, lanes), 0)
                    valid = (gb * tile_rows + off + row) < M
                    num = jnp.where(valid, num, 0.0)
                    den = jnp.where(valid, den, 0.0)
                num_ref[0, 0:cs, :] += num
                den_ref[0, 0:cs, :] += den

        is_partial = (gb + 1) * tile_rows > M

        @pl.when(jnp.logical_not(is_partial))
        def _():
            accumulate(False)     # fast path: no iota / compare / select

        @pl.when(is_partial)
        def _():
            accumulate(True)

    return kernel


def _pick_tile_rows(M, tm_max):
    if M <= 1024:
        return M                  # single small block (full-extent → legal)
    # aim for at least ~4 pipeline steps; tile rows multiple of 8
    tile = max(512, ((M + 3) // 4) // 8 * 8)
    return min(tile, tm_max)


def mse_loss(inp, target, region, *, lanes=_LANES):
    """Pallas equivalent of:
         loss = ((sigmoid(inp) - target)**2 * region).sum() / region.sum()
    Accepts inputs of any dtype/shape; returns a float32 scalar."""
    x = jnp.ravel(jnp.asarray(inp))
    t = jnp.ravel(jnp.asarray(target))
    r = jnp.ravel(jnp.asarray(region))
    n = x.shape[0]
    M = n // lanes                # full 128-lane rows fed to the kernel
    tail = n - M * lanes          # <= 127 trailing elements

    f32 = jnp.float32
    if tail:
        xt = x[M * lanes:].astype(f32)
        tt = t[M * lanes:].astype(f32)
        rt = r[M * lanes:].astype(f32)
        st = 0.5 * jnp.tanh(0.5 * xt) + 0.5
        dt = st - tt
        num_tail = jnp.sum(dt * dt * rt)
        den_tail = jnp.sum(rt)
    else:
        num_tail = jnp.zeros((), f32)
        den_tail = jnp.zeros((), f32)

    if M == 0:                    # tiny inputs: pure XLA
        return num_tail / den_tail

    # TODO(synk): for ragged n (tail != 0) XLA still materializes one copy of
    # the aligned prefix below; a fully zero-copy ragged path would need
    # manual DMA from a pl.ANY ref.
    x2 = x[: M * lanes].reshape(M, lanes)
    t2 = t[: M * lanes].reshape(M, lanes)
    r2 = r[: M * lanes].reshape(M, lanes)

    # Dtype/BW-aware tile: ~12 MiB of double-buffered input per step.
    row_bytes = lanes * (x2.dtype.itemsize + t2.dtype.itemsize + r2.dtype.itemsize)
    tm_max = ((12 << 20) // (2 * row_bytes)) // 512 * 512
    tm_max = max(512, min(8192, tm_max))
    tile_rows = _pick_tile_rows(M, tm_max)
    acc_rows = min(_ACC_ROWS_MAX, tile_rows)

    nb = pl.cdiv(M, tile_rows)    # number of row blocks
    ncores = min(2, nb)           # leading "parallel" axis (2 TCs on v7x)
    spc = pl.cdiv(nb, ncores)     # row blocks per core

    # 3 inputs x 2 buffers x tile + 2 outputs x 2 buffers x acc + margin.
    vmem_limit = 2 * tile_rows * row_bytes + 4 * acc_rows * lanes * 4 + (2 << 20)
    vmem_limit = int(min(max(vmem_limit, 4 << 20), 48 << 20))

    # Clamp overhanging block indices so the auto-generated DMA never goes
    # out of bounds; their contribution is zeroed by the in-kernel row mask.
    in_map = lambda p, i: (jnp.minimum(p * spc + i, nb - 1), 0)
    out_map = lambda p, i: (p, 0, 0)

    num_p, den_p = pl.pallas_call(
        _make_kernel(M, tile_rows, acc_rows, lanes),
        out_shape=(
            jax.ShapeDtypeStruct((ncores, acc_rows, lanes), jnp.float32),
            jax.ShapeDtypeStruct((ncores, acc_rows, lanes), jnp.float32),
        ),
        grid_spec=pltpu.PrefetchScalarGridSpec(
            num_scalar_prefetch=0,
            grid=(ncores, spc),
            in_specs=[pl.BlockSpec((tile_rows, lanes), in_map)] * 3,
            out_specs=[pl.BlockSpec((1, acc_rows, lanes), out_map)] * 2,
        ),
        compiler_params=pltpu.CompilerParams(
            dimension_semantics=("parallel", "arbitrary"),
            vmem_limit_bytes=vmem_limit,
        ),
    )(x2, t2, r2)

    num = jnp.sum(num_p) + num_tail
    den = jnp.sum(den_p) + den_tail
    return num / den


if __name__ == "__main__":
    key = jax.random.PRNGKey(0)

    def ref_loss(i_, t_, r_):
        s = jax.nn.sigmoid(i_.astype(jnp.float32))
        return (jnp.sum((s - t_.astype(jnp.float32)) ** 2 * r_.astype(jnp.float32))
                / jnp.sum(r_.astype(jnp.float32)))

    def make_inputs(k, shape):
        k1, k2, k3 = jax.random.split(k, 3)
        inp = jax.random.normal(k1, shape, dtype=jnp.float32)
        tgt = jax.random.uniform(k2, shape, dtype=jnp.float32)
        reg = (jax.random.uniform(k3, shape) > 0.5).astype(jnp.float32)
        reg = reg.reshape(-1).at[0].set(1.0).reshape(shape)   # region.sum() > 0
        return inp, tgt, reg

    k_a, k_b, k_c = jax.random.split(key, 3)

    # 1) Small NCHW segmentation-style shape (n % 128 == 0, fast aligned path).
    inp, tgt, reg = make_inputs(k_a, (2, 4, 16, 16))
    loss = jax.block_until_ready(mse_loss(inp, tgt, reg))
    ref = ref_loss(inp, tgt, reg)
    assert jnp.allclose(loss, ref, rtol=1e-5, atol=1e-6), (loss, ref)

    # 2) Ragged size (n % 128 != 0): kernel prefix + XLA-side tail fold-in.
    inp, tgt, reg = make_inputs(k_b, (2, 3, 15, 17))
    loss = jax.block_until_ready(mse_loss(inp, tgt, reg))
    ref = ref_loss(inp, tgt, reg)
    assert jnp.allclose(loss, ref, rtol=1e-5, atol=1e-6), (loss, ref)

    # 3) Multi-block case exercising the 2-way parallel split, the chunked
    #    accumulator, and the masked partial/overhanging edge blocks.
    inp, tgt, reg = make_inputs(k_c, (1500 * 128 + 50,))
    loss = jax.block_until_ready(mse_loss(inp, tgt, reg))
    ref = ref_loss(inp, tgt, reg)
    assert jnp.allclose(loss, ref, rtol=1e-4, atol=1e-6), (loss, ref)

    print("KERNEL_OK")
</pallas_src>

<mosaic_0001>
module attributes {stable_mosaic.version = 11 : i64} {
  func.func @kernel(%arg0: i32, %arg1: i32, %arg2: memref<16x128xf32, #tpu.memory_space<vmem>>, %arg3: memref<16x128xf32, #tpu.memory_space<vmem>>, %arg4: memref<16x128xf32, #tpu.memory_space<vmem>>, %arg5: memref<1x16x128xf32, #tpu.memory_space<vmem>>, %arg6: memref<1x16x128xf32, #tpu.memory_space<vmem>>) attributes {dimension_semantics = [#tpu.dimension_semantics<parallel>, #tpu.dimension_semantics<arbitrary>], iteration_bounds = array<i64: 1, 1>, scalar_prefetch = 0 : i64, scratch_operands = 0 : i64, tpu.core_type = #tpu.core_type<tc>, window_params = [{transform_indices = @transform_0, window_bounds = array<i64: 16, 128>}, {transform_indices = @transform_1, window_bounds = array<i64: 16, 128>}, {transform_indices = @transform_2, window_bounds = array<i64: 16, 128>}, {transform_indices = @transform_3, window_bounds = array<i64: 1, 16, 128>}, {transform_indices = @transform_4, window_bounds = array<i64: 1, 16, 128>}]} {
    %c1_i32 = arith.constant 1 : i32
    %0 = arith.muli %arg0, %c1_i32 : i32
    %1 = arith.addi %0, %arg1 : i32
    %c0_i32 = arith.constant 0 : i32
    %2 = arith.cmpi eq, %arg1, %c0_i32 : i32
    %3 = arith.extui %2 : i1 to i32
    %c0_i32_0 = arith.constant 0 : i32
    %4 = arith.cmpi ne, %3, %c0_i32_0 : i32
    scf.if %4 {
      %cst = arith.constant 0.000000e+00 : f32
      %13 = vector.broadcast %cst : f32 to vector<1x16x128xf32>
      %c0 = arith.constant 0 : index
      %c0_5 = arith.constant 0 : index
      %c0_6 = arith.constant 0 : index
      %14 = vector.load %arg5[%c0, %c0_5, %c0_6] : memref<1x16x128xf32, #tpu.memory_space<vmem>>, vector<1x16x128xf32>
      tpu.vector_store %arg5[%c0, %c0_5, %c0_6], %13 {strides = array<i32>} : memref<1x16x128xf32, #tpu.memory_space<vmem>>, vector<1x16x128xf32>,
      %cst_7 = arith.constant 0.000000e+00 : f32
      %15 = vector.broadcast %cst_7 : f32 to vector<1x16x128xf32>
      %c0_8 = arith.constant 0 : index
      %c0_9 = arith.constant 0 : index
      %c0_10 = arith.constant 0 : index
      %16 = vector.load %arg6[%c0_8, %c0_9, %c0_10] : memref<1x16x128xf32, #tpu.memory_space<vmem>>, vector<1x16x128xf32>
      tpu.vector_store %arg6[%c0_8, %c0_9, %c0_10], %15 {strides = array<i32>} : memref<1x16x128xf32, #tpu.memory_space<vmem>>, vector<1x16x128xf32>,
    } else {
    }
    %c1_i32_1 = arith.constant 1 : i32
    %5 = arith.addi %1, %c1_i32_1 : i32
    %c16_i32 = arith.constant 16 : i32
    %6 = arith.muli %5, %c16_i32 : i32
    %c16_i32_2 = arith.constant 16 : i32
    %7 = arith.cmpi sgt, %6, %c16_i32_2 : i32
    %true = arith.constant true
    %8 = arith.xori %7, %true : i1
    %9 = arith.extui %8 : i1 to i32
    %c0_i32_3 = arith.constant 0 : i32
    %10 = arith.cmpi ne, %9, %c0_i32_3 : i32
    scf.if %10 {
      %c0 = arith.constant 0 : index
      %c0_5 = arith.constant 0 : index
      %13 = vector.load %arg2[%c0, %c0_5] : memref<16x128xf32, #tpu.memory_space<vmem>>, vector<16x128xf32>
      %c0_6 = arith.constant 0 : index
      %c0_7 = arith.constant 0 : index
      %14 = vector.load %arg3[%c0_6, %c0_7] : memref<16x128xf32, #tpu.memory_space<vmem>>, vector<16x128xf32>
      %c0_8 = arith.constant 0 : index
      %c0_9 = arith.constant 0 : index
      %15 = vector.load %arg4[%c0_8, %c0_9] : memref<16x128xf32, #tpu.memory_space<vmem>>, vector<16x128xf32>
      %cst = arith.constant 5.000000e-01 : f32
      %16 = vector.broadcast %cst : f32 to vector<16x128xf32>
      %17 = arith.mulf %16, %13 : vector<16x128xf32>
      %18 = math.tanh %17 : vector<16x128xf32>
      %cst_10 = arith.constant 5.000000e-01 : f32
      %19 = vector.broadcast %cst_10 : f32 to vector<16x128xf32>
      %20 = arith.mulf %19, %18 : vector<16x128xf32>
      %cst_11 = arith.constant 5.000000e-01 : f32
      %21 = vector.broadcast %cst_11 : f32 to vector<16x128xf32>
      %22 = arith.addf %20, %21 : vector<16x128xf32>
      %23 = arith.subf %22, %14 : vector<16x128xf32>
      %24 = arith.mulf %23, %23 : vector<16x128xf32>
      %25 = arith.mulf %24, %15 : vector<16x128xf32>
      %c0_12 = arith.constant 0 : index
      %c0_13 = arith.constant 0 : index
      %c0_14 = arith.constant 0 : index
      %26 = vector.load %arg5[%c0_12, %c0_13, %c0_14] : memref<1x16x128xf32, #tpu.memory_space<vmem>>, vector<1x16x128xf32>
      %27 = vector.shape_cast %26 : vector<1x16x128xf32> to vector<16x128xf32>
      %28 = arith.addf %27, %25 : vector<16x128xf32>
      %c0_15 = arith.constant 0 : index
      %c0_16 = arith.constant 0 : index
      %c0_17 = arith.constant 0 : index
      %29 = vector.load %arg5[%c0_15, %c0_16, %c0_17] : memref<1x16x128xf32, #tpu.memory_space<vmem>>, vector<1x16x128xf32>
      %30 = vector.shape_cast %29 : vector<1x16x128xf32> to vector<16x128xf32>
      %31 = vector.shape_cast %28 : vector<16x128xf32> to vector<1x16x128xf32>
      tpu.vector_store %arg5[%c0_15, %c0_16, %c0_17], %31 {strides = array<i32>} : memref<1x16x128xf32, #tpu.memory_space<vmem>>, vector<1x16x128xf32>,
      %c0_18 = arith.constant 0 : index
      %c0_19 = arith.constant 0 : index
      %c0_20 = arith.constant 0 : index
      %32 = vector.load %arg6[%c0_18, %c0_19, %c0_20] : memref<1x16x128xf32, #tpu.memory_space<vmem>>, vector<1x16x128xf32>
      %33 = vector.shape_cast %32 : vector<1x16x128xf32> to vector<16x128xf32>
      %34 = arith.addf %33, %15 : vector<16x128xf32>
      %c0_21 = arith.constant 0 : index
      %c0_22 = arith.constant 0 : index
      %c0_23 = arith.constant 0 : index
      %35 = vector.load %arg6[%c0_21, %c0_22, %c0_23] : memref<1x16x128xf32, #tpu.memory_space<vmem>>, vector<1x16x128xf32>
      %36 = vector.shape_cast %35 : vector<1x16x128xf32> to vector<16x128xf32>
      %37 = vector.shape_cast %34 : vector<16x128xf32> to vector<1x16x128xf32>
      tpu.vector_store %arg6[%c0_21, %c0_22, %c0_23], %37 {strides = array<i32>} : memref<1x16x128xf32, #tpu.memory_space<vmem>>, vector<1x16x128xf32>,
    } else {
    }
    %11 = arith.extui %7 : i1 to i32
    %c0_i32_4 = arith.constant 0 : i32
    %12 = arith.cmpi ne, %11, %c0_i32_4 : i32
    scf.if %12 {
      %c0 = arith.constant 0 : index
      %c0_5 = arith.constant 0 : index
      %13 = vector.load %arg2[%c0, %c0_5] : memref<16x128xf32, #tpu.memory_space<vmem>>, vector<16x128xf32>
      %c0_6 = arith.constant 0 : index
      %c0_7 = arith.constant 0 : index
      %14 = vector.load %arg3[%c0_6, %c0_7] : memref<16x128xf32, #tpu.memory_space<vmem>>, vector<16x128xf32>
      %c0_8 = arith.constant 0 : index
      %c0_9 = arith.constant 0 : index
      %15 = vector.load %arg4[%c0_8, %c0_9] : memref<16x128xf32, #tpu.memory_space<vmem>>, vector<16x128xf32>
      %cst = arith.constant 5.000000e-01 : f32
      %16 = vector.broadcast %cst : f32 to vector<16x128xf32>
      %17 = arith.mulf %16, %13 : vector<16x128xf32>
      %18 = math.tanh %17 : vector<16x128xf32>
      %cst_10 = arith.constant 5.000000e-01 : f32
      %19 = vector.broadcast %cst_10 : f32 to vector<16x128xf32>
      %20 = arith.mulf %19, %18 : vector<16x128xf32>
      %cst_11 = arith.constant 5.000000e-01 : f32
      %21 = vector.broadcast %cst_11 : f32 to vector<16x128xf32>
      %22 = arith.addf %20, %21 : vector<16x128xf32>
      %23 = arith.subf %22, %14 : vector<16x128xf32>
      %24 = arith.mulf %23, %23 : vector<16x128xf32>
      %25 = arith.mulf %24, %15 : vector<16x128xf32>
      %26 = tpu.iota {dimensions = array<i32: 0>} : vector<16x128xi32>
      %c16_i32_12 = arith.constant 16 : i32
      %27 = arith.muli %1, %c16_i32_12 : i32
      %c0_i32_13 = arith.constant 0 : i32
      %28 = arith.addi %27, %c0_i32_13 : i32
      %29 = vector.broadcast %28 : i32 to vector<16x128xi32>
      %30 = arith.addi %29, %26 : vector<16x128xi32>
      %c16_i32_14 = arith.constant 16 : i32
      %31 = vector.broadcast %c16_i32_14 : i32 to vector<16x128xi32>
      %32 = arith.cmpi slt, %30, %31 : vector<16x128xi32>
      %cst_15 = arith.constant 0.000000e+00 : f32
      %33 = vector.broadcast %cst_15 : f32 to vector<16x128xf32>
      %34 = arith.select %32, %25, %33 : vector<16x128xi1>, vector<16x128xf32>
      %cst_16 = arith.constant 0.000000e+00 : f32
      %35 = vector.broadcast %cst_16 : f32 to vector<16x128xf32>
      %36 = arith.select %32, %15, %35 : vector<16x128xi1>, vector<16x128xf32>
      %c0_17 = arith.constant 0 : index
      %c0_18 = arith.constant 0 : index
      %c0_19 = arith.constant 0 : index
      %37 = vector.load %arg5[%c0_17, %c0_18, %c0_19] : memref<1x16x128xf32, #tpu.memory_space<vmem>>, vector<1x16x128xf32>
      %38 = vector.shape_cast %37 : vector<1x16x128xf32> to vector<16x128xf32>
      %39 = arith.addf %38, %34 : vector<16x128xf32>
      %c0_20 = arith.constant 0 : index
      %c0_21 = arith.constant 0 : index
      %c0_22 = arith.constant 0 : index
      %40 = vector.load %arg5[%c0_20, %c0_21, %c0_22] : memref<1x16x128xf32, #tpu.memory_space<vmem>>, vector<1x16x128xf32>
      %41 = vector.shape_cast %40 : vector<1x16x128xf32> to vector<16x128xf32>
      %42 = vector.shape_cast %39 : vector<16x128xf32> to vector<1x16x128xf32>
      tpu.vector_store %arg5[%c0_20, %c0_21, %c0_22], %42 {strides = array<i32>} : memref<1x16x128xf32, #tpu.memory_space<vmem>>, vector<1x16x128xf32>,
      %c0_23 = arith.constant 0 : index
      %c0_24 = arith.constant 0 : index
      %c0_25 = arith.constant 0 : index
      %43 = vector.load %arg6[%c0_23, %c0_24, %c0_25] : memref<1x16x128xf32, #tpu.memory_space<vmem>>, vector<1x16x128xf32>
      %44 = vector.shape_cast %43 : vector<1x16x128xf32> to vector<16x128xf32>
      %45 = arith.addf %44, %36 : vector<16x128xf32>
      %c0_26 = arith.constant 0 : index
      %c0_27 = arith.constant 0 : index
      %c0_28 = arith.constant 0 : index
      %46 = vector.load %arg6[%c0_26, %c0_27, %c0_28] : memref<1x16x128xf32, #tpu.memory_space<vmem>>, vector<1x16x128xf32>
      %47 = vector.shape_cast %46 : vector<1x16x128xf32> to vector<16x128xf32>
      %48 = vector.shape_cast %45 : vector<16x128xf32> to vector<1x16x128xf32>
      tpu.vector_store %arg6[%c0_26, %c0_27, %c0_28], %48 {strides = array<i32>} : memref<1x16x128xf32, #tpu.memory_space<vmem>>, vector<1x16x128xf32>,
    } else {
    }
    return
  }
  func.func @transform_0(%arg0: i32, %arg1: i32) -> (i32, i32) {
    %c1_i32 = arith.constant 1 : i32
    %0 = arith.muli %arg0, %c1_i32 : i32
    %1 = arith.addi %0, %arg1 : i32
    %c0_i32 = arith.constant 0 : i32
    %2 = arith.minsi %1, %c0_i32 : i32
    %c0_i32_0 = arith.constant 0 : i32
    %c0_i32_1 = arith.constant 0 : i32
    return %2, %c0_i32_0 : i32, i32
  }
  func.func @transform_1(%arg0: i32, %arg1: i32) -> (i32, i32) {
    %c1_i32 = arith.constant 1 : i32
    %0 = arith.muli %arg0, %c1_i32 : i32
    %1 = arith.addi %0, %arg1 : i32
    %c0_i32 = arith.constant 0 : i32
    %2 = arith.minsi %1, %c0_i32 : i32
    %c0_i32_0 = arith.constant 0 : i32
    %c0_i32_1 = arith.constant 0 : i32
    return %2, %c0_i32_0 : i32, i32
  }
  func.func @transform_2(%arg0: i32, %arg1: i32) -> (i32, i32) {
    %c1_i32 = arith.constant 1 : i32
    %0 = arith.muli %arg0, %c1_i32 : i32
    %1 = arith.addi %0, %arg1 : i32
    %c0_i32 = arith.constant 0 : i32
    %2 = arith.minsi %1, %c0_i32 : i32
    %c0_i32_0 = arith.constant 0 : i32
    %c0_i32_1 = arith.constant 0 : i32
    return %2, %c0_i32_0 : i32, i32
  }
  func.func @transform_3(%arg0: i32, %arg1: i32) -> (i32, i32, i32) {
    %c0_i32 = arith.constant 0 : i32
    %c0_i32_0 = arith.constant 0 : i32
    %c0_i32_1 = arith.constant 0 : i32
    return %arg0, %c0_i32, %c0_i32_0 : i32, i32, i32
  }
  func.func @transform_4(%arg0: i32, %arg1: i32) -> (i32, i32, i32) {
    %c0_i32 = arith.constant 0 : i32
    %c0_i32_0 = arith.constant 0 : i32
    %c0_i32_1 = arith.constant 0 : i32
    return %arg0, %c0_i32, %c0_i32_0 : i32, i32, i32
  }
}

</mosaic_0001>

<bundles_post_ra>
// kernel: tpu_custom_call.1
= control target key start
LH: loop header
LB: loop body
LE: loop exit
PB: predicated region body
PF: predicated region fallthrough
CT: control target
= control target key end

     0   :  { %10 = vsyncpa [#allocation3], 0  ;;  %s437_s0 = inlined_call_operand.hbm [shape: f32[16,128], index: 0, kind: input, shape index: {}]   ;;  %s438_s1 = inlined_call_operand.hbm [shape: f32[16,128], index: 1, kind: input, shape index: {}]   ;;  %s439_s2 = inlined_call_operand.hbm [shape: f32[16,128], index: 2, kind: input, shape index: {}]   ;;  %s440_s3 = inlined_call_operand.hbm [shape: f32[1,16,128], index: 3, kind: output, shape index: {0}]   ;;  %s441_s4 = inlined_call_operand.hbm [shape: f32[1,16,128], index: 4, kind: output, shape index: {1}]  }
   0x1   :  { %11 = vsyncpa [#allocation6], 0 }
   0x2   :  { %12 = vsyncpa [#allocation4], 0 }
   0x3   :  { %13 = vsyncpa [#allocation10], 0  ;;  %s43_s17 = sshll.u32 %s438_s1, 4  ;;  %s375_s18 = smov [#allocation5]   ;;  %s44_s17 = int_to_ptr.hbm [resolvable:$true] %s43_s17 }
   0x4   :  { %s45_s19 = sshll.u32 %s375_s18, 4  ;;  %s24_s22 = sshll.u32 %s437_s0, 4  ;;  %s46_s19 = int_to_ptr.vmem [resolvable:$true] %s45_s19  ;;  %s25_s22 = int_to_ptr.hbm [resolvable:$true] %s24_s22 }
   0x5   :  { %s376_s23 = smov 128   ;;  %s377_s24 = smov 8  }
   0x6   :  { %51 = dma.hbm_to_vmem [thread:$0]  %s44_s17, 256, %s46_s19, [#allocation6], %s376_s23, %s376_s23, %s377_s24  }
   0x7   :  { %s378_s25 = smov [#allocation2]   ;;  %s62_s1 = sshll.u32 %s439_s2, 4  ;;  %s63_s1 = int_to_ptr.hbm [resolvable:$true] %s62_s1 }
   0x8   :  { %s26_s26 = sshll.u32 %s378_s25, 4  ;;  %s379_s0 = smov [#allocation7]   ;;  %s27_s26 = int_to_ptr.vmem [resolvable:$true] %s26_s26 }
   0x9   :  { %32 = dma.hbm_to_vmem [thread:$0]  %s25_s22, 256, %s27_s26, [#allocation3], %s376_s23, %s376_s23, %s377_s24  }
   0xa   :  { %s64_s29 = sshll.u32 %s379_s0, 4  ;;  %s65_s29 = int_to_ptr.vmem [resolvable:$true] %s64_s29 }
   0xb   :  { %70 = dma.hbm_to_vmem [thread:$0]  %s63_s1, 256, %s65_s29, [#allocation6], %s376_s23, %s376_s23, %s377_s24  }
   0xc   :  { %367 = dma.done.wait [#allocation3], 256  }
   0xd   :  { %368 = vsyncadd [#allocation3], 4294967040 }
   0xe   :  { %369 = dma.done.wait [#allocation6], 512  }
   0xf   :  { %370 = vsyncadd [#allocation6], 4294966784  ;;  %s380_s30 = smov [#allocation9]   ;;  %s210_s7 = sshll.u32 %s441_s4, 4  ;;  %v111_v0 = vld [vmem:[#allocation2] sm:$0xff]  ;;  %v112_v3 = vld [vmem:[#allocation2 + $0x8] sm:$0xff]  ;;  %s211_s7 = int_to_ptr.hbm [resolvable:$true] %s210_s7 }
  0x10   :  { %s208_s5 = sshll.u32 %s380_s30, 4  ;;  %v115_v1 = vld [vmem:[#allocation7] sm:$0xff]  ;;  %v117_v2 = vmul.f32 0.5, %v111_v0  ;;  %v116_v4 = vld [vmem:[#allocation7 + $0x8] sm:$0xff]  ;;  %v118_v5 = vmul.f32 0.5, %v112_v3  ;;  %v113_v9 = vld [vmem:[#allocation5] sm:$0xff]  ;;  %s209_s5 = int_to_ptr.vmem [resolvable:$true] %s208_s5 }
  0x11   :  { %141 = vst [vmem:[#allocation9] sm:$0xff] %v115_v1  ;;  %v114_v12 = vld [vmem:[#allocation5 + $0x8] sm:$0xff]  ;;  %s381_s4 = smov [#allocation8]   ;;  %s197_s11 = sshll.u32 %s440_s3, 4  ;;  %s198_s11 = int_to_ptr.hbm [resolvable:$true] %s197_s11 }
  0x12   :  { %243 = vtanh.f32 %v117_v2  ;;  %142 = vst [vmem:[#allocation9 + $0x8] sm:$0xff] %v116_v4  ;;  %s195_s8 = sshll.u32 %s381_s4, 4  ;;  %s196_s8 = int_to_ptr.vmem [resolvable:$true] %s195_s8 }
  0x13   :  { %245 = vtanh.f32 %v118_v5  ;;  %216 = dma.vmem_to_hbm [thread:$0]  %s209_s5, 256, %s211_s7, [#allocation10], %s376_s23, %s376_s23, %s377_s24  }
  0x18   :  { %v244_v6 = vpop.eup %243 }
  0x19   :  { %v246_v7 = vpop.eup %245  ;;  %v121_v8 = vmul.f32 0.5, %v244_v6 }
  0x1a   :  { %v122_v10 = vmul.f32 0.5, %v246_v7 }
  0x1b   :  { %v123_v11 = vadd.f32 0.5, %v121_v8 }
  0x1c   :  { %v124_v13 = vadd.f32 0.5, %v122_v10 }
  0x1d   :  { %v125_v14 = vsub.f32 %v123_v11, %v113_v9 }
  0x1e   :  { %v126_v15 = vsub.f32 %v124_v13, %v114_v12 }
  0x1f   :  { %v127_v16 = vmul.f32 %v125_v14, %v125_v14 }
  0x20   :  { %v128_v17 = vmul.f32 %v126_v15, %v126_v15 }
  0x21   :  { %v129_v18 = vmul.f32 %v127_v16, %v115_v1 }
  0x22   :  { %v130_v19 = vmul.f32 %v128_v17, %v116_v4 }
  0x23   :  { %135 = vst [vmem:[#allocation8] sm:$0xff] %v129_v18 }
  0x24   :  { %136 = vst [vmem:[#allocation8 + $0x8] sm:$0xff] %v130_v19 }
  0x25   :  { %203 = dma.vmem_to_hbm [thread:$0]  %s196_s8, 256, %s198_s11, [#allocation4], %s376_s23, %s376_s23, %s377_s24  }
  0x26   :  { %371 = dma.done.wait [#allocation4], 256  }
  0x27   :  { %372 = vsyncadd [#allocation4], 4294967040 }
  0x28   :  { %373 = dma.done.wait [#allocation10], 256  }
  0x29   :  { %374 = vsyncadd [#allocation10], 4294967040 }
  0x2a   :  { %225 = vsyncpa [#allocation3], 1 }
  0x2b   :  { %226 = vsyncpa [#allocation6], 1 }
  0x2c   :  { %227 = vsyncpa [#allocation4], 1 }
  0x2d   :  { %228 = vsyncpa [#allocation10], 1 }

</bundles_post_ra>
